<compile_context>
chip_gen: v6e
topology: v6e:2x2x1
jax: 0.10.0
libtpu: 0.0.40
codegen_flags: <defaults>
</compile_context>

<pallas_src>
import functools

import jax
import jax.numpy as jnp
from jax.experimental import pallas as pl
from jax.experimental.pallas import tpu as pltpu

MARGIN = 1.0
EPS = 1e-6  # matches torch.nn.functional.pairwise_distance default


def _round_up(x, m):
    return (x + m - 1) // m * m


def _contrastive_loss_kernel(o1_ref, o2_ref, label_ref, loss_ref, acc_ref, *,
                             true_b, tile_b, margin):
    step = pl.program_id(0)

    @pl.when(step == 0)
    def _():
        acc_ref[0] = jnp.float32(0.0)

    # Elementwise diff (+eps, as in F.pairwise_distance), squared-sum reduce
    # along the lane (feature) axis, sqrt, then the contrastive combination.
    diff = o1_ref[...].astype(jnp.float32) - o2_ref[...].astype(jnp.float32) + EPS
    dist = jnp.sqrt(jnp.sum(diff * diff, axis=-1, keepdims=True))          # (TB, 1)
    label = label_ref[...].astype(jnp.float32)                              # (TB, 1)
    per_example = (1.0 - label) * dist + label * jnp.maximum(margin - dist, 0.0)

    # Mask out any rows that are zero-padding appended by the wrapper.
    row = jax.lax.broadcasted_iota(jnp.int32, per_example.shape, 0) + step * tile_b
    per_example = jnp.where(row < true_b, per_example, 0.0)

    # Scalar running sum on the SMEM path.
    acc_ref[0] += jnp.sum(per_example)

    @pl.when(step == pl.num_programs(0) - 1)
    def _():
        loss_ref[0, 0] = acc_ref[0] / jnp.float32(true_b)


def contrastive_loss(output1, output2, label, margin=MARGIN):
    """output1, output2: (B, D) float; label: (B, 1) float -> scalar f32 loss."""
    B, D = output1.shape
    assert output2.shape == (B, D)
    assert label.shape == (B, 1)

    itemsize = jnp.dtype(output1.dtype).itemsize
    # Largest row tile (multiple of 8) such that the double-buffered o1+o2
    # tiles (2 inputs x 2 buffers x TB x D x itemsize) stay under ~8 MiB —
    # comfortably inside the scoped-VMEM default on v5e/v6e/v7x.
    vmem_budget = 8 * 1024 * 1024
    tb = min(1024, max(8, vmem_budget // (2 * 2 * D * itemsize)), _round_up(B, 8))
    tb = max(8, (tb // 8) * 8)

    b_pad = _round_up(B, tb)
    if b_pad != B:
        pad = b_pad - B
        output1 = jnp.pad(output1, ((0, pad), (0, 0)))
        output2 = jnp.pad(output2, ((0, pad), (0, 0)))
        label = jnp.pad(label, ((0, pad), (0, 0)))

    grid = (b_pad // tb,)
    kernel = functools.partial(
        _contrastive_loss_kernel, true_b=B, tile_b=tb, margin=float(margin))

    out = pl.pallas_call(
        kernel,
        out_shape=jax.ShapeDtypeStruct((1, 1), jnp.float32),
        grid=grid,
        in_specs=[
            pl.BlockSpec((tb, D), lambda i: (i, 0)),
            pl.BlockSpec((tb, D), lambda i: (i, 0)),
            pl.BlockSpec((tb, 1), lambda i: (i, 0)),
        ],
        # Scalar loss lives in SMEM (no lane-masked VMEM stores of a (1,1) tile).
        out_specs=pl.BlockSpec(memory_space=pltpu.MemorySpace.SMEM),
        scratch_shapes=[pltpu.SMEM((1,), jnp.float32)],
        compiler_params=pltpu.CompilerParams(
            # Single grid axis is a sequential reduction over batch tiles.
            dimension_semantics=("arbitrary",),
        ),
    )(output1, output2, label)
    return out[0, 0]


def _reference_loss(o1, o2, label, margin=MARGIN):
    o1 = o1.astype(jnp.float32)
    o2 = o2.astype(jnp.float32)
    label = label.astype(jnp.float32)
    d = jnp.sqrt(jnp.sum((o1 - o2 + EPS) ** 2, axis=-1, keepdims=True))
    return jnp.mean((1.0 - label) * d + label * jnp.maximum(margin - d, 0.0))


if __name__ == "__main__":
    key = jax.random.PRNGKey(0)
    k1, k2, k3 = jax.random.split(key, 3)

    B, D = 8, 32
    output1 = jax.random.normal(k1, (B, D), dtype=jnp.float32)
    output2 = jax.random.normal(k2, (B, D), dtype=jnp.float32)
    label = jax.random.bernoulli(k3, 0.5, (B, 1)).astype(jnp.float32)

    loss = contrastive_loss(output1, output2, label)
    jax.block_until_ready(loss)

    ref = _reference_loss(output1, output2, label)
    assert jnp.allclose(loss, ref, rtol=1e-5, atol=1e-5), (loss, ref)

    # Also exercise the padded / multi-tile path (B not a multiple of the tile).
    B2, D2 = 37, 32
    kk1, kk2, kk3 = jax.random.split(jax.random.PRNGKey(1), 3)
    a = jax.random.normal(kk1, (B2, D2), dtype=jnp.float32)
    b = jax.random.normal(kk2, (B2, D2), dtype=jnp.float32)
    lab = jax.random.bernoulli(kk3, 0.5, (B2, 1)).astype(jnp.float32)
    loss2 = contrastive_loss(a, b, lab)
    jax.block_until_ready(loss2)
    ref2 = _reference_loss(a, b, lab)
    assert jnp.allclose(loss2, ref2, rtol=1e-5, atol=1e-5), (loss2, ref2)

    print("KERNEL_OK")
</pallas_src>

<mosaic_0001>
module attributes {stable_mosaic.version = 11 : i64} {
  func.func @_contrastive_loss_kernel(%arg0: i32, %arg1: memref<8x32xf32, #tpu.memory_space<vmem>>, %arg2: memref<8x32xf32, #tpu.memory_space<vmem>>, %arg3: memref<8x1xf32, #tpu.memory_space<vmem>>, %arg4: memref<1x1xf32, #tpu.memory_space<smem>>, %arg5: memref<1xf32, #tpu.memory_space<smem>>) attributes {dimension_semantics = [#tpu.dimension_semantics<arbitrary>], iteration_bounds = array<i64: 1>, scalar_prefetch = 0 : i64, scratch_operands = 1 : i64, tpu.core_type = #tpu.core_type<tc>, window_params = [{transform_indices = @transform_0, window_bounds = array<i64: 8, 32>}, {transform_indices = @transform_1, window_bounds = array<i64: 8, 32>}, {transform_indices = @transform_2, window_bounds = array<i64: 8, 1>}, {transform_indices = @transform_3, window_bounds = array<i64: 1, 1>}]} {
    %c0_i32 = arith.constant 0 : i32
    %0 = arith.cmpi eq, %arg0, %c0_i32 : i32
    %1 = arith.extui %0 : i1 to i32
    %c0_i32_0 = arith.constant 0 : i32
    %2 = arith.cmpi ne, %1, %c0_i32_0 : i32
    scf.if %2 {
      %cst_17 = arith.constant 0.000000e+00 : f32
      %c0_18 = arith.constant 0 : index
      %40 = memref.load %arg5[%c0_18] : memref<1xf32, #tpu.memory_space<smem>>
      memref.store %cst_17, %arg5[%c0_18] : memref<1xf32, #tpu.memory_space<smem>>
    } else {
    }
    %c0 = arith.constant 0 : index
    %c0_1 = arith.constant 0 : index
    %3 = vector.load %arg1[%c0, %c0_1] : memref<8x32xf32, #tpu.memory_space<vmem>>, vector<8x32xf32>
    %c0_2 = arith.constant 0 : index
    %c0_3 = arith.constant 0 : index
    %4 = vector.load %arg2[%c0_2, %c0_3] : memref<8x32xf32, #tpu.memory_space<vmem>>, vector<8x32xf32>
    %5 = arith.subf %3, %4 : vector<8x32xf32>
    %cst = arith.constant 9.99999997E-7 : f32
    %6 = vector.broadcast %cst : f32 to vector<8x32xf32>
    %7 = arith.addf %5, %6 : vector<8x32xf32>
    %8 = arith.mulf %7, %7 : vector<8x32xf32>
    %cst_4 = arith.constant dense<0.000000e+00> : vector<8xf32>
    %9 = vector.multi_reduction <add>, %8, %cst_4 [1] : vector<8x32xf32> to vector<8xf32>
    %10 = vector.shape_cast %9 : vector<8xf32> to vector<8x1xf32>
    %11 = math.sqrt %10 : vector<8x1xf32>
    %c0_5 = arith.constant 0 : index
    %c0_6 = arith.constant 0 : index
    %12 = vector.load %arg3[%c0_5, %c0_6] : memref<8x1xf32, #tpu.memory_space<vmem>>, vector<8x1xf32>
    %cst_7 = arith.constant 1.000000e+00 : f32
    %13 = vector.broadcast %cst_7 : f32 to vector<8x1xf32>
    %14 = arith.subf %13, %12 : vector<8x1xf32>
    %15 = arith.mulf %14, %11 : vector<8x1xf32>
    %cst_8 = arith.constant 1.000000e+00 : f32
    %16 = vector.broadcast %cst_8 : f32 to vector<8x1xf32>
    %17 = arith.subf %16, %11 : vector<8x1xf32>
    %cst_9 = arith.constant 0.000000e+00 : f32
    %18 = vector.broadcast %cst_9 : f32 to vector<8x1xf32>
    %19 = arith.maximumf %17, %18 : vector<8x1xf32>
    %20 = arith.mulf %12, %19 : vector<8x1xf32>
    %21 = arith.addf %15, %20 : vector<8x1xf32>
    %22 = tpu.iota {dimensions = array<i32: 0>} : vector<8x1xi32>
    %c8_i32 = arith.constant 8 : i32
    %23 = arith.muli %arg0, %c8_i32 : i32
    %24 = vector.broadcast %23 : i32 to vector<8x1xi32>
    %25 = arith.addi %22, %24 : vector<8x1xi32>
    %c8_i32_10 = arith.constant 8 : i32
    %26 = vector.broadcast %c8_i32_10 : i32 to vector<8x1xi32>
    %27 = arith.cmpi slt, %25, %26 : vector<8x1xi32>
    %cst_11 = arith.constant 0.000000e+00 : f32
    %28 = vector.broadcast %cst_11 : f32 to vector<8x1xf32>
    %29 = arith.select %27, %21, %28 : vector<8x1xi1>, vector<8x1xf32>
    %c0_12 = arith.constant 0 : index
    %30 = memref.load %arg5[%c0_12] : memref<1xf32, #tpu.memory_space<smem>>
    %31 = vector.shape_cast %29 : vector<8x1xf32> to vector<1x8x1xf32>
    %cst_13 = arith.constant dense<0.000000e+00> : vector<1xf32>
    %32 = vector.multi_reduction <add>, %31, %cst_13 [1, 2] : vector<1x8x1xf32> to vector<1xf32>
    %33 = vector.shape_cast %32 : vector<1xf32> to vector<1x1x1xf32>
    %34 = vector.extract %33[0, 0, 0] : f32 from vector<1x1x1xf32>
    %35 = arith.addf %30, %34 : f32
    %c0_14 = arith.constant 0 : index
    %36 = memref.load %arg5[%c0_14] : memref<1xf32, #tpu.memory_space<smem>>
    memref.store %35, %arg5[%c0_14] : memref<1xf32, #tpu.memory_space<smem>>
    %c0_i32_15 = arith.constant 0 : i32
    %37 = arith.cmpi eq, %arg0, %c0_i32_15 : i32
    %38 = arith.extui %37 : i1 to i32
    %c0_i32_16 = arith.constant 0 : i32
    %39 = arith.cmpi ne, %38, %c0_i32_16 : i32
    scf.if %39 {
      %c0_17 = arith.constant 0 : index
      %40 = memref.load %arg5[%c0_17] : memref<1xf32, #tpu.memory_space<smem>>
      %cst_18 = arith.constant 8.000000e+00 : f32
      %41 = arith.divf %40, %cst_18 : f32
      %c0_19 = arith.constant 0 : index
      %c0_20 = arith.constant 0 : index
      %42 = memref.load %arg4[%c0_19, %c0_20] : memref<1x1xf32, #tpu.memory_space<smem>>
      memref.store %41, %arg4[%c0_19, %c0_20] : memref<1x1xf32, #tpu.memory_space<smem>>
    } else {
    }
    return
  }
  func.func @transform_0(%arg0: i32) -> (i32, i32) {
    %c0_i32 = arith.constant 0 : i32
    %c0_i32_0 = arith.constant 0 : i32
    return %arg0, %c0_i32 : i32, i32
  }
  func.func @transform_1(%arg0: i32) -> (i32, i32) {
    %c0_i32 = arith.constant 0 : i32
    %c0_i32_0 = arith.constant 0 : i32
    return %arg0, %c0_i32 : i32, i32
  }
  func.func @transform_2(%arg0: i32) -> (i32, i32) {
    %c0_i32 = arith.constant 0 : i32
    %c0_i32_0 = arith.constant 0 : i32
    return %arg0, %c0_i32 : i32, i32
  }
  func.func @transform_3(%arg0: i32) -> (i32, i32) {
    %c0_i32 = arith.constant 0 : i32
    %c0_i32_0 = arith.constant 0 : i32
    %c0_i32_1 = arith.constant 0 : i32
    return %c0_i32, %c0_i32_0 : i32, i32
  }
}

</mosaic_0001>

<bundles_post_ra>
// kernel: tpu_custom_call.1
= control target key start
LH: loop header
LB: loop body
LE: loop exit
PB: predicated region body
PF: predicated region fallthrough
CT: control target
= control target key end

     0   :  { %8 = vsyncpa [#allocation4], 0  ;;  %s173_s0 = inlined_call_operand.vmem [shape: f32[8,32], index: 0, kind: input, shape index: {}]   ;;  %s174_s1 = inlined_call_operand.hbm [shape: f32[8,32], index: 1, kind: input, shape index: {}]   ;;  %s175_s2 = inlined_call_operand.vmem [shape: f32[8,1], index: 2, kind: input, shape index: {}]   ;;  %s176_s3 = inlined_call_operand.hbm [shape: f32[1,1], index: 3, kind: output, shape index: {}]  }
   0x1   :  { %9 = vsyncpa [#allocation5], 0  ;;  %s139_s12 = smov [#allocation3]  }
   0x2   :  { %s18_s13 = sshll.u32 %s139_s12, 4  ;;  %s19_s13 = int_to_ptr.vmem [resolvable:$true] %s18_s13 }
   0x3   :  { %s115_s14 = scalar_lea.vmem %s19_s13, 128  ;;  %p120_p1 = scmp.lt.s32.totalorder %s19_s13, %s19_s13 }
   0x4   :  { %p116_p0 = scmp.ne.s32.totalorder %s19_s13, %s115_s14  ;;  %p121_p2 = scmp.lt.s32.totalorder %s115_s14, %s115_s14 }
   0x6   :  { %p122_p3 = por %p121_p2, %p120_p1 }
   0x8   :  { %p123_p4 = pnand %p122_p3, %p116_p0 }
   0xa   :  { %126 = shalt.err (!%p123_p4)
}
   0xb   :  { %21 = dma.hbm_to_vmem [thread:$0]  %s174_s1, 128, %s19_s13, [#allocation4]  }
   0xc   :  { %135 = dma.done.wait [#allocation4], 128  }
   0xd   :  { %136 = vsyncadd [#allocation4], 4294967168  ;;  %v33_v0 = vld [vmem:[%s173_s0] sm:$0xff]  ;;  %vm38_vm0 = vcmask 261120   ;;  %vm64_vm3 = vcmask 7168   ;;  %s140_s20 = smov [#allocation6]  }
   0xe   :  { %v34_v1 = vld [vmem:[#allocation3] sm:$0xff] }
   0xf   :  { %v35_v2 = vsub.f32 %v33_v0, %v34_v1  ;;  %v49_v10 = vld [vmem:[%s175_s2] sm:$0xff] }
  0x10   :  { %v50_v13 = vsub.f32 1.0, %v49_v10 }
  0x11   :  { %v36_v3 = vadd.f32 1e-06, %v35_v2 }
  0x13   :  { %v37_v4 = vmul.f32 %v36_v3, %v36_v3 }
  0x15   :  { %v39_v5 = vsel %vm38_vm0, %v37_v4, 0.0 }
  0x16   :  { %40 = vadd.xlane.f32.xlu0 %v39_v5 }
  0x9f   :  { %v41_v6 = vpop.xlane.xlu0 %40 }
  0xa0   :  { %105 = vrsqrt.f32 %v41_v6  ;;  %vm44_vm1 = vcmp.eq.f32.partialorder %v41_v6, inf  ;;  %v47_v9 = vand.u32 2147483648, %v41_v6  ;;  %vm46_vm2 = vcmp.eq.f32.partialorder %v41_v6, 0.0 }
  0xad   :  { %v106_v7 = vpop.eup %105 }
  0xae   :  { %v43_v8 = vmul.f32 %v106_v7, %v41_v6 }
  0xb0   :  { %v45_v11 = vsel %vm44_vm1, %v41_v6, %v43_v8 }
  0xb1   :  { %v48_v12 = vsel %vm46_vm2, %v47_v9, %v45_v11 }
  0xb2   :  { %v52_v14 = vsub.f32 1.0, %v48_v12  ;;  %v51_v16 = vmul.f32 %v50_v13, %v48_v12 }
  0xb4   :  { %v53_v15 = vmax.f32 %v52_v14, 0.0 }
  0xb6   :  { %v54_v17 = vmul.f32 %v53_v15, %v49_v10 }
  0xb8   :  { %v55_v18 = vadd.f32 %v54_v17, %v51_v16 }
  0xba   :  { %v65_v19 = vsel %vm64_vm3, %v55_v18, 0.0 }
  0xbb   :  { %66 = vadd.xlane.f32.xlu0 %v65_v19 }
 0x144   :  { %v67_v20 = vpop.xlane.xlu0 %66 }
 0x145   :  { %v68_v21 = vrot.slane %v67_v20, 4 }
 0x147   :  { %v69_v22 = vadd.f32 %v68_v21, %v67_v20 }
 0x149   :  { %v70_v23 = vrot.slane %v69_v22, 2 }
 0x14b   :  { %v71_v24 = vadd.f32 %v70_v23, %v69_v22 }
 0x14d   :  { %v72_v25 = vrot.slane %v71_v24, 1 }
 0x14f   :  { %v73_v26 = vadd.f32 %v72_v25, %v71_v24 }
 0x151   :  { %101 = vpush %v73_v26 }
 0x182   :  { %s102_s0 = spop %101 }
 0x183   :  { %s84_s2 = smul.f32 0.125, %s102_s0 }
 0x185   :  { %86 = sst [smem:[#allocation6]] %s84_s2 }
 0x186   :  { %94 = dma.smem_to_hbm %s140_s20, 16, %s176_s3, [#allocation5]  }
 0x187   :  { %137 = dma.done.wait [#allocation5], 16  }
 0x188   :  { %138 = vsyncadd [#allocation5], 4294967280 }
 0x189   :  { %98 = sfence }
 0x18a   :  { %99 = vsyncpa [#allocation4], 1 }
 0x18b   :  { %100 = vsyncpa [#allocation5], 1 }

</bundles_post_ra>
